<compile_context>
chip_gen: v6e
topology: v6e:2x2x1
jax: 0.10.0
libtpu: 0.0.40
codegen_flags: <defaults>
</compile_context>

<pallas_src>
import functools

import jax
import jax.numpy as jnp
from jax.experimental import pallas as pl
from jax.experimental.pallas import tpu as pltpu


def _round_up(n, m):
    return (n + m - 1) // m * m


def _adain_kernel(x_ref, w_ref, b_ref, o_ref, *, eps, hw):
    # x_ref: (tile_r, hw_pad)  one row == one (batch, channel) instance.
    # Padded columns are zero, so sum / sum-of-squares are unaffected; we divide
    # by the true hw.  Padded rows produce var=0 -> rsqrt(eps), no NaN.
    x = x_ref[...].astype(jnp.float32)
    s = jnp.sum(x, axis=-1, keepdims=True)
    ss = jnp.sum(x * x, axis=-1, keepdims=True)
    inv_hw = jnp.float32(1.0 / hw)
    mean = s * inv_hw
    var = jnp.maximum(ss * inv_hw - mean * mean, 0.0)  # biased variance
    inv_std = jax.lax.rsqrt(var + eps)
    w = w_ref[...].astype(jnp.float32)
    b = b_ref[...].astype(jnp.float32)
    scale = inv_std * w
    shift = b - mean * scale
    o_ref[...] = (x * scale + shift).astype(o_ref.dtype)


def _choose_tile_rows(rows, hw_pad, itemsize):
    """Row-tile so one x tile is ~2 MiB, multiple of 8, capped at the padded rows."""
    target_bytes = 2 * 1024 * 1024
    t = (target_bytes // (hw_pad * itemsize)) // 8 * 8
    t = max(8, int(t))
    t = min(t, _round_up(rows, 8))
    return t


def adaptive_instance_norm_2d(x, weight, bias, eps=1e-5):
    """AdaIN forward.

    x:      (B, C, H, W)  NCHW
    weight: (B*C,)  per-instance scale (assigned externally, MUNIT style)
    bias:   (B*C,)  per-instance shift
    """
    B, C, H, W = x.shape
    rows = B * C
    hw = H * W

    hw_pad = _round_up(hw, 128)          # lane-dense output slab
    tile_r = _choose_tile_rows(rows, hw_pad, jnp.dtype(x.dtype).itemsize)
    rows_pad = _round_up(rows, tile_r)   # last row-tile fully covered
    n_tiles = rows_pad // tile_r

    x2 = jnp.pad(x.reshape(rows, hw), ((0, rows_pad - rows), (0, hw_pad - hw)))
    w2 = jnp.pad(weight.astype(jnp.float32).reshape(rows, 1),
                 ((0, rows_pad - rows), (0, 0)))
    b2 = jnp.pad(bias.astype(jnp.float32).reshape(rows, 1),
                 ((0, rows_pad - rows), (0, 0)))

    kernel = functools.partial(_adain_kernel, eps=eps, hw=hw)
    out2 = pl.pallas_call(
        kernel,
        out_shape=jax.ShapeDtypeStruct((rows_pad, hw_pad), x.dtype),
        grid_spec=pltpu.PrefetchScalarGridSpec(
            num_scalar_prefetch=0,
            grid=(n_tiles,),
            in_specs=[
                pl.BlockSpec((tile_r, hw_pad), lambda i: (i, 0)),
                pl.BlockSpec((tile_r, 1), lambda i: (i, 0)),
                pl.BlockSpec((tile_r, 1), lambda i: (i, 0)),
            ],
            out_specs=pl.BlockSpec((tile_r, hw_pad), lambda i: (i, 0)),
        ),
        compiler_params=pltpu.CompilerParams(
            dimension_semantics=("parallel",),   # rows are independent -> megacore on v7x
        ),
    )(x2, w2, b2)

    return out2[:rows, :hw].reshape(B, C, H, W)


def _reference(x, weight, bias, eps=1e-5):
    B, C, H, W = x.shape
    xr = x.reshape(B * C, H * W).astype(jnp.float32)
    mean = xr.mean(axis=-1, keepdims=True)
    var = ((xr - mean) ** 2).mean(axis=-1, keepdims=True)
    out = (xr - mean) / jnp.sqrt(var + eps)
    out = out * weight.reshape(-1, 1) + bias.reshape(-1, 1)
    return out.reshape(B, C, H, W).astype(x.dtype)


if __name__ == "__main__":
    B, C, H, W = 2, 4, 16, 16
    num_features = C
    eps = 1e-5

    key = jax.random.PRNGKey(0)
    kx, kw, kb = jax.random.split(key, 3)

    x = jax.random.normal(kx, (B, C, H, W), dtype=jnp.float32)
    # AdaIN affine params are assigned externally (length B*C); init deterministically.
    weight = jax.random.normal(kw, (B * C,), dtype=jnp.float32) + 1.0
    bias = jax.random.normal(kb, (B * C,), dtype=jnp.float32) * 0.1

    # Buffers from __init__ (unused in the forward output, kept for fidelity).
    running_mean = jnp.zeros((num_features,), dtype=jnp.float32)
    running_var = jnp.ones((num_features,), dtype=jnp.float32)

    out = adaptive_instance_norm_2d(x, weight, bias, eps=eps)
    out = jax.block_until_ready(out)

    ref = _reference(x, weight, bias, eps=eps)
    assert out.shape == (B, C, H, W)
    assert jnp.allclose(out, ref, atol=1e-4, rtol=1e-4), "mismatch vs reference"

    print("KERNEL_OK")
</pallas_src>

<mosaic_0001>
module attributes {stable_mosaic.version = 11 : i64} {
  func.func @_adain_kernel(%arg0: i32, %arg1: memref<8x256xf32, #tpu.memory_space<vmem>>, %arg2: memref<8x1xf32, #tpu.memory_space<vmem>>, %arg3: memref<8x1xf32, #tpu.memory_space<vmem>>, %arg4: memref<8x256xf32, #tpu.memory_space<vmem>>) attributes {dimension_semantics = [#tpu.dimension_semantics<parallel>], iteration_bounds = array<i64: 1>, scalar_prefetch = 0 : i64, scratch_operands = 0 : i64, tpu.core_type = #tpu.core_type<tc>, window_params = [{transform_indices = @transform_0, window_bounds = array<i64: 8, 256>}, {transform_indices = @transform_1, window_bounds = array<i64: 8, 1>}, {transform_indices = @transform_2, window_bounds = array<i64: 8, 1>}, {transform_indices = @transform_3, window_bounds = array<i64: 8, 256>}]} {
    %c0 = arith.constant 0 : index
    %c0_0 = arith.constant 0 : index
    %0 = vector.load %arg1[%c0, %c0_0] : memref<8x256xf32, #tpu.memory_space<vmem>>, vector<8x256xf32>
    %cst = arith.constant dense<0.000000e+00> : vector<8xf32>
    %1 = vector.multi_reduction <add>, %0, %cst [1] : vector<8x256xf32> to vector<8xf32>
    %2 = vector.shape_cast %1 : vector<8xf32> to vector<8x1xf32>
    %3 = arith.mulf %0, %0 : vector<8x256xf32>
    %cst_1 = arith.constant dense<0.000000e+00> : vector<8xf32>
    %4 = vector.multi_reduction <add>, %3, %cst_1 [1] : vector<8x256xf32> to vector<8xf32>
    %5 = vector.shape_cast %4 : vector<8xf32> to vector<8x1xf32>
    %cst_2 = arith.constant 3.906250e-03 : f32
    %6 = vector.broadcast %cst_2 : f32 to vector<8x1xf32>
    %7 = arith.mulf %2, %6 : vector<8x1xf32>
    %cst_3 = arith.constant 3.906250e-03 : f32
    %8 = vector.broadcast %cst_3 : f32 to vector<8x1xf32>
    %9 = arith.mulf %5, %8 : vector<8x1xf32>
    %10 = arith.mulf %7, %7 : vector<8x1xf32>
    %11 = arith.subf %9, %10 : vector<8x1xf32>
    %cst_4 = arith.constant 0.000000e+00 : f32
    %12 = vector.broadcast %cst_4 : f32 to vector<8x1xf32>
    %13 = arith.maximumf %11, %12 : vector<8x1xf32>
    %cst_5 = arith.constant 9.99999974E-6 : f32
    %14 = vector.broadcast %cst_5 : f32 to vector<8x1xf32>
    %15 = arith.addf %13, %14 : vector<8x1xf32>
    %16 = math.rsqrt %15 : vector<8x1xf32>
    %c0_6 = arith.constant 0 : index
    %c0_7 = arith.constant 0 : index
    %17 = vector.load %arg2[%c0_6, %c0_7] : memref<8x1xf32, #tpu.memory_space<vmem>>, vector<8x1xf32>
    %c0_8 = arith.constant 0 : index
    %c0_9 = arith.constant 0 : index
    %18 = vector.load %arg3[%c0_8, %c0_9] : memref<8x1xf32, #tpu.memory_space<vmem>>, vector<8x1xf32>
    %19 = arith.mulf %16, %17 : vector<8x1xf32>
    %20 = arith.mulf %7, %19 : vector<8x1xf32>
    %21 = arith.subf %18, %20 : vector<8x1xf32>
    %22 = vector.broadcast %19 : vector<8x1xf32> to vector<8x256xf32>
    %23 = arith.mulf %0, %22 : vector<8x256xf32>
    %24 = vector.broadcast %21 : vector<8x1xf32> to vector<8x256xf32>
    %25 = arith.addf %23, %24 : vector<8x256xf32>
    %c0_10 = arith.constant 0 : index
    %c0_11 = arith.constant 0 : index
    %26 = vector.load %arg4[%c0_10, %c0_11] : memref<8x256xf32, #tpu.memory_space<vmem>>, vector<8x256xf32>
    tpu.vector_store %arg4[%c0_10, %c0_11], %25 {strides = array<i32>} : memref<8x256xf32, #tpu.memory_space<vmem>>, vector<8x256xf32>,
    return
  }
  func.func @transform_0(%arg0: i32) -> (i32, i32) {
    %c0_i32 = arith.constant 0 : i32
    %c0_i32_0 = arith.constant 0 : i32
    return %arg0, %c0_i32 : i32, i32
  }
  func.func @transform_1(%arg0: i32) -> (i32, i32) {
    %c0_i32 = arith.constant 0 : i32
    %c0_i32_0 = arith.constant 0 : i32
    return %arg0, %c0_i32 : i32, i32
  }
  func.func @transform_2(%arg0: i32) -> (i32, i32) {
    %c0_i32 = arith.constant 0 : i32
    %c0_i32_0 = arith.constant 0 : i32
    return %arg0, %c0_i32 : i32, i32
  }
  func.func @transform_3(%arg0: i32) -> (i32, i32) {
    %c0_i32 = arith.constant 0 : i32
    %c0_i32_0 = arith.constant 0 : i32
    return %arg0, %c0_i32 : i32, i32
  }
}

</mosaic_0001>

<bundles_post_ra>
// kernel: tpu_custom_call.1
= control target key start
LH: loop header
LB: loop body
LE: loop exit
PB: predicated region body
PF: predicated region fallthrough
CT: control target
= control target key end

     0   :  { %s132_s0 = inlined_call_operand.vmem [shape: f32[8,256], index: 0, kind: input, shape index: {}]   ;;  %s133_s1 = inlined_call_operand.vmem [shape: f32[8,1], index: 1, kind: input, shape index: {}]   ;;  %s134_s2 = inlined_call_operand.vmem [shape: f32[8,1], index: 2, kind: input, shape index: {}]   ;;  %s135_s3 = inlined_call_operand.hbm [shape: f32[8,256], index: 3, kind: output, shape index: {}]  }
   0x1   :  { %v15_v0 = vld [vmem:[%s132_s0] sm:$0xff]  ;;  %v16_v1 = vld [vmem:[%s132_s0 + $0x8] sm:$0xff] }
   0x2   :  { %8 = vsyncpa [#allocation3], 0  ;;  %v17_v2 = vadd.f32 %v16_v1, %v15_v0  ;;  %v20_v3 = vmul.f32 %v15_v0, %v15_v0  ;;  %v21_v4 = vmul.f32 %v16_v1, %v16_v1  ;;  %v95_v6 = vmov 0   ;;  %v32_v15 = vld [vmem:[%s133_s1] sm:$0xff]  ;;  %s96_s19 = smov [#allocation2]  }
   0x3   :  { %69 = vset.pattern.permute.xlu1 %v95_v6  ;;  %70 = vset.pattern.permute.xlu0 %v95_v6  ;;  %v33_v18 = vld [vmem:[%s134_s2] sm:$0xff]  ;;  %s59_s20 = sshll.u32 %s96_s19, 4  ;;  %s60_s20 = int_to_ptr.vmem [resolvable:$true] %s59_s20 }
   0x4   :  { %18 = vadd.xlane.f32.xlu0 %v17_v2  ;;  %v22_v5 = vadd.f32 %v21_v4, %v20_v3  ;;  %s73_s1 = scalar_lea.vmem %s60_s20, 256  ;;  %p78_p1 = scmp.lt.s32.totalorder %s60_s20, %s60_s20 }
   0x5   :  { %p74_p0 = scmp.ne.s32.totalorder %s60_s20, %s73_s1  ;;  %p79_p2 = scmp.lt.s32.totalorder %s73_s1, %s73_s1 }
   0x7   :  { %p80_p3 = por %p79_p2, %p78_p1 }
   0x8   :  { %23 = vadd.xlane.f32.xlu0 %v22_v5 }
   0x9   :  { %p81_p4 = pnand %p80_p3, %p74_p0 }
  0x8d   :  { %v19_v7 = vpop.xlane.xlu0 %18 }
  0x8e   :  { %v25_v8 = vmul.f32 0.00390625, %v19_v7 }
  0x90   :  { %v27_v10 = vmul.f32 %v25_v8, %v25_v8 }
  0x91   :  { %v24_v9 = vpop.xlane.xlu0 %23 }
  0x92   :  { %v26_v11 = vmul.f32 0.00390625, %v24_v9 }
  0x94   :  { %v28_v12 = vsub.f32 %v26_v11, %v27_v10 }
  0x96   :  { %v29_v13 = vmax.f32 %v28_v12, 0.0 }
  0x98   :  { %v30_v14 = vadd.f32 1e-05, %v29_v13 }
  0x9a   :  { %71 = vrsqrt.f32 %v30_v14 }
  0xa7   :  { %v72_v16 = vpop.eup %71 }
  0xa8   :  { %v34_v17 = vmul.f32 %v72_v16, %v32_v15 }
  0xaa   :  { %39 = vperm.xlu1 %69, %v34_v17   ;;  %v35_v19 = vmul.f32 %v34_v17, %v25_v8 }
  0xac   :  { %v36_v20 = vsub.f32 %v33_v18, %v35_v19 }
  0xae   :  { %46 = vperm.xlu1 %69, %v36_v20  }
 0x125   :  { %v40_v21 = vpop.permute.xlu1 %39 }
 0x126   :  { %v42_v22 = vmul.f32 %v40_v21, %v15_v0  ;;  %v43_v23 = vmul.f32 %v40_v21, %v16_v1 }
 0x129   :  { %v47_v24 = vpop.permute.xlu1 %46 }
 0x12a   :  { %v49_v25 = vadd.f32 %v47_v24, %v42_v22  ;;  %v50_v26 = vadd.f32 %v47_v24, %v43_v23 }
 0x12c   :  { %51 = vst [vmem:[#allocation2] sm:$0xff] %v49_v25  ;;  %52 = vst [vmem:[#allocation2 + $0x8] sm:$0xff] %v50_v26 }
 0x12d   :  { %84 = shalt.err (!%p81_p4)
}
 0x12e   :  { %62 = dma.vmem_to_hbm [thread:$0]  %s60_s20, 256, %s135_s3, [#allocation3]  }
 0x12f   :  { %93 = dma.done.wait [#allocation3], 256  }
 0x130   :  { %94 = vsyncadd [#allocation3], 4294967040 }
 0x131   :  { %66 = vsyncpa [#allocation3], 1 }

</bundles_post_ra>
